<compile_context>
chip_gen: v7x
topology: tpu7x:2x2x1
jax: 0.10.0
libtpu: 0.0.40
codegen_flags: <defaults>
</compile_context>

<pallas_src>
import numpy as np
import jax
import jax.numpy as jnp
from jax import lax
from jax.experimental import pallas as pl
from jax.experimental.pallas import tpu as pltpu


# ---------------------------------------------------------------------------
# small helpers
# ---------------------------------------------------------------------------

def _cdiv(a, b):
    return -(-a // b)


def _round_up(a, b):
    return _cdiv(a, b) * b


_TINY_FALLBACK_BYTES = 32 * 1024   # below this, XLA's fused reduce is faster
_TILE_A_CAP = 256                  # cap on sublane batching of the A axis


def _vmem_budgets():
    """Generation-aware (single-input-block budget, vmem_limit_bytes).

    The input is double-buffered by the Pallas pipeline, so input VMEM is ~2x
    the block budget; the output block and f32 accumulator are small.
    """
    vmem_cap = 64 * 1024 * 1024                       # conservative (v7x-like)
    try:
        vmem_cap = int(pltpu.get_tpu_info().vmem_capacity_bytes)
    except Exception:
        pass
    if vmem_cap >= 96 * 1024 * 1024:                  # v5e / v6e: 128 MiB VMEM
        return 14 * 1024 * 1024, 80 * 1024 * 1024
    return 10 * 1024 * 1024, 44 * 1024 * 1024         # v7x: 64 MiB VMEM


# ---------------------------------------------------------------------------
# kernel factory (shared by both layouts)
# ---------------------------------------------------------------------------

def _make_mean_kernel(*, inv_p, true_p, tile_p, ragged_p, use_scratch,
                      p_axis, keepdims):
    """Sum over block axis 1 (the pooled axis) with f32 accumulation.

    The accumulator is either an f32 VMEM scratch (non-f32 outputs) or the
    resident output block itself (f32 outputs).  The reduction grid axis
    `p_axis` is innermost: init at p == 0, finalize (* 1/P) at p == last.
    When the last P tile overhangs the array (`ragged_p`), its out-of-range
    rows/lanes hold unspecified data and must be masked before accumulating.
    """

    def kernel(h_ref, o_ref, *scratch):
        acc_ref = scratch[0] if use_scratch else o_ref
        p = pl.program_id(p_axis)
        last = pl.num_programs(p_axis) - 1

        @pl.when(p == 0)
        def _init():
            acc_ref[...] = jnp.zeros_like(acc_ref)

        x = h_ref[...].astype(jnp.float32)

        def _accumulate(v):
            acc_ref[...] += jnp.sum(v, axis=1, keepdims=keepdims)

        if ragged_p:
            @pl.when(p != last)
            def _body():
                _accumulate(x)

            @pl.when(p == last)
            def _tail():
                idx = lax.broadcasted_iota(jnp.int32, x.shape, 1)
                _accumulate(jnp.where(p * tile_p + idx < true_p, x, 0.0))
        else:
            _accumulate(x)

        @pl.when(p == last)
        def _finalize():
            if use_scratch:
                o_ref[...] = (acc_ref[...] * inv_p).astype(o_ref.dtype)
            else:
                o_ref[...] = o_ref[...] * inv_p   # hoisted 1/P multiply

    return kernel


# ---------------------------------------------------------------------------
# general path: pooled axis is not last  ->  (A, P, B) view, B on lanes
# ---------------------------------------------------------------------------

def _mean_pool_general(h3, A, P, B, itemsize, blk_budget, vmem_limit):
    dtype = h3.dtype
    use_scratch = dtype != jnp.float32

    # Lane (B) tile: full extent when <= 1024, else 1024-wide tiles.  When A
    # gives no parallelism, split B so both v7x TensorCores get work.
    if B > 1024:
        tile_b = 1024
    elif A <= 8 and B >= 256:
        tile_b = min(B, _round_up(_cdiv(B, 2), 128))
    else:
        tile_b = B

    # A (sublane batch) and P (reduction) tiles under the VMEM budget.
    row_bytes = tile_b * itemsize
    full_p_bytes = max(P * row_bytes, 1)
    a_rows_at_full_p = blk_budget // full_p_bytes
    if a_rows_at_full_p >= min(A, 8):
        tile_p = P                                     # single reduction step
        tile_a = min(A, a_rows_at_full_p, _TILE_A_CAP)
        if tile_a < A:
            tile_a = max(8, (tile_a // 8) * 8)
    else:
        tile_a = A if A < 8 else 8
        tile_p = blk_budget // (tile_a * row_bytes)
        tile_p = max(8, (tile_p // 8) * 8)
        if tile_p >= P:
            tile_p = P

    ragged_p = (tile_p < P) and (P % tile_p != 0)
    grid = (_cdiv(A, tile_a), _cdiv(B, tile_b), _cdiv(P, tile_p))

    kernel = _make_mean_kernel(inv_p=1.0 / P, true_p=P, tile_p=tile_p,
                               ragged_p=ragged_p, use_scratch=use_scratch,
                               p_axis=2, keepdims=False)
    scratch = [pltpu.VMEM((tile_a, tile_b), jnp.float32)] if use_scratch else []

    return pl.pallas_call(
        kernel,
        out_shape=jax.ShapeDtypeStruct((A, B), dtype),
        grid_spec=pltpu.PrefetchScalarGridSpec(
            num_scalar_prefetch=0,
            grid=grid,
            in_specs=[pl.BlockSpec((tile_a, tile_p, tile_b),
                                   lambda a, b, p: (a, p, b))],
            out_specs=pl.BlockSpec((tile_a, tile_b), lambda a, b, p: (a, b)),
            scratch_shapes=scratch,
        ),
        compiler_params=pltpu.CompilerParams(
            dimension_semantics=("parallel", "parallel", "arbitrary"),
            vmem_limit_bytes=vmem_limit,
        ),
    )(h3)


# ---------------------------------------------------------------------------
# lane-major path: pooled axis is last (B == 1)  ->  (A, P) view, P on lanes
# ---------------------------------------------------------------------------

def _mean_pool_lastdim(h2, A, P, itemsize, blk_budget, vmem_limit):
    dtype = h2.dtype
    use_scratch = dtype != jnp.float32

    tile_p = P if P <= 1024 else 1024                  # lane tile of pooled axis
    tile_a = blk_budget // max(tile_p * itemsize, 1)
    tile_a = max(1, min(tile_a, A, 1024))
    if tile_a < A:
        tile_a = max(8, (tile_a // 8) * 8)

    ragged_p = (tile_p < P) and (P % tile_p != 0)
    grid = (_cdiv(A, tile_a), _cdiv(P, tile_p))

    kernel = _make_mean_kernel(inv_p=1.0 / P, true_p=P, tile_p=tile_p,
                               ragged_p=ragged_p, use_scratch=use_scratch,
                               p_axis=1, keepdims=True)
    scratch = [pltpu.VMEM((tile_a, 1), jnp.float32)] if use_scratch else []

    return pl.pallas_call(
        kernel,
        out_shape=jax.ShapeDtypeStruct((A, 1), dtype),
        grid_spec=pltpu.PrefetchScalarGridSpec(
            num_scalar_prefetch=0,
            grid=grid,
            in_specs=[pl.BlockSpec((tile_a, tile_p), lambda a, p: (a, p))],
            out_specs=pl.BlockSpec((tile_a, 1), lambda a, p: (a, 0)),
            scratch_shapes=scratch,
        ),
        compiler_params=pltpu.CompilerParams(
            dimension_semantics=("parallel", "arbitrary"),
            vmem_limit_bytes=vmem_limit,
        ),
    )(h2)


# ---------------------------------------------------------------------------
# public wrapper (== MeanPooling.forward semantics)
# ---------------------------------------------------------------------------

def mean_pooling(h, pooling_dim=0, *, block_bytes=None):
    """Equivalent of torch.mean(h, dim=pooling_dim, keepdim=True)."""
    if not jnp.issubdtype(h.dtype, jnp.floating):
        raise TypeError("mean_pooling requires a floating-point input "
                        "(torch.mean rejects integer dtypes).")
    shape = tuple(int(s) for s in h.shape)
    ndim = len(shape)
    d = pooling_dim % ndim
    out_shape = shape[:d] + (1,) + shape[d + 1:]

    P = shape[d]
    if P == 1:                                         # mean over a singleton axis
        return h.reshape(out_shape)

    itemsize = jnp.dtype(h.dtype).itemsize
    if int(np.prod(shape)) * itemsize < _TINY_FALLBACK_BYTES and block_bytes is None:
        # Tiny tensors: pallas_call launch + grid overhead dwarfs the work.
        return jnp.mean(h, axis=d, keepdims=True)

    A = int(np.prod(shape[:d], dtype=np.int64)) if d > 0 else 1
    B = int(np.prod(shape[d + 1:], dtype=np.int64)) if d + 1 < ndim else 1

    blk_budget, vmem_limit = _vmem_budgets()
    if block_bytes is not None:                        # test/tuning override
        blk_budget = int(block_bytes)

    if B == 1:
        out2 = _mean_pool_lastdim(h.reshape(A, P), A, P, itemsize,
                                  blk_budget, vmem_limit)
    else:
        out2 = _mean_pool_general(h.reshape(A, P, B), A, P, B, itemsize,
                                  blk_budget, vmem_limit)
    return out2.reshape(out_shape)


class MeanPooling:
    """Mirror of the PyTorch module: x_context / x_target are unused."""

    def __init__(self, pooling_dim=0):
        self.pooling_dim = pooling_dim

    def __call__(self, h, x_context=None, x_target=None):
        return mean_pooling(h, self.pooling_dim)


# ---------------------------------------------------------------------------
# demo / self-test
# ---------------------------------------------------------------------------

if __name__ == "__main__":
    key = jax.random.PRNGKey(0)
    k1, k2, k3, k4 = jax.random.split(key, 4)

    # CNP-style encoding: (num_context_points, batch, hidden).
    h1 = jax.random.normal(k1, (64, 2, 128), dtype=jnp.float32)

    # 1) module default: pool over dim 0 (general path, full-P block).
    pool = MeanPooling(pooling_dim=0)
    out0 = jax.block_until_ready(pool(h1))
    ref0 = jnp.mean(h1, axis=0, keepdims=True)
    assert out0.shape == ref0.shape == (1, 2, 128)
    assert jnp.allclose(out0, ref0, atol=1e-4, rtol=1e-4)

    # 2) middle dim (general path, A-batched, sublane-dense output block).
    out1 = jax.block_until_ready(mean_pooling(h1, pooling_dim=1))
    ref1 = jnp.mean(h1, axis=1, keepdims=True)
    assert out1.shape == ref1.shape == (64, 1, 128)
    assert jnp.allclose(out1, ref1, atol=1e-4, rtol=1e-4)

    # 3) last dim (lane-major path).
    out2 = jax.block_until_ready(mean_pooling(h1, pooling_dim=-1))
    ref2 = jnp.mean(h1, axis=-1, keepdims=True)
    assert out2.shape == ref2.shape == (64, 2, 1)
    assert jnp.allclose(out2, ref2, atol=1e-4, rtol=1e-4)

    # 4) lane-major path with a ragged reduction tail (P = 1300 > 1024).
    h2 = jax.random.normal(k2, (16, 1300), dtype=jnp.float32)
    out3 = jax.block_until_ready(mean_pooling(h2, pooling_dim=1))
    ref3 = jnp.mean(h2, axis=1, keepdims=True)
    assert out3.shape == ref3.shape == (16, 1)
    assert jnp.allclose(out3, ref3, atol=1e-4, rtol=1e-4)

    # 5) general path with a ragged reduction tail (forced small P tile).
    h3 = jax.random.normal(k3, (70, 2, 128), dtype=jnp.float32)
    out4 = jax.block_until_ready(mean_pooling(h3, pooling_dim=0,
                                              block_bytes=16 * 1024))
    ref4 = jnp.mean(h3, axis=0, keepdims=True)
    assert out4.shape == ref4.shape == (1, 2, 128)
    assert jnp.allclose(out4, ref4, atol=1e-4, rtol=1e-4)

    # 6) bf16 input: f32 scratch accumulator, bf16 output.
    h4 = jax.random.normal(k4, (64, 4, 128), dtype=jnp.bfloat16)
    out5 = jax.block_until_ready(mean_pooling(h4, pooling_dim=0))
    ref5 = jnp.mean(h4.astype(jnp.float32), axis=0, keepdims=True)
    assert out5.shape == (1, 4, 128) and out5.dtype == jnp.bfloat16
    assert jnp.allclose(out5.astype(jnp.float32), ref5, atol=2e-2, rtol=2e-2)

    # 7) tiny tensor: jnp.mean fallback path.
    h5 = jax.random.normal(k1, (8, 2, 32), dtype=jnp.float32)
    out6 = jax.block_until_ready(mean_pooling(h5, pooling_dim=0))
    assert jnp.allclose(out6, jnp.mean(h5, axis=0, keepdims=True),
                        atol=1e-6, rtol=1e-6)

    print("KERNEL_OK")
</pallas_src>

<mosaic_0001>
module attributes {stable_mosaic.version = 11 : i64} {
  func.func @kernel(%arg0: i32, %arg1: i32, %arg2: i32, %arg3: memref<1x64x128xf32, #tpu.memory_space<vmem>>, %arg4: memref<1x128xf32, #tpu.memory_space<vmem>>) attributes {dimension_semantics = [#tpu.dimension_semantics<parallel>, #tpu.dimension_semantics<parallel>, #tpu.dimension_semantics<arbitrary>], iteration_bounds = array<i64: 1, 2, 1>, scalar_prefetch = 0 : i64, scratch_operands = 0 : i64, tpu.core_type = #tpu.core_type<tc>, window_params = [{transform_indices = @transform_0, window_bounds = array<i64: 1, 64, 128>}, {transform_indices = @transform_1, window_bounds = array<i64: 1, 128>}]} {
    %c0_i32 = arith.constant 0 : i32
    %0 = arith.cmpi eq, %arg2, %c0_i32 : i32
    %1 = arith.extui %0 : i1 to i32
    %c0_i32_0 = arith.constant 0 : i32
    %2 = arith.cmpi ne, %1, %c0_i32_0 : i32
    scf.if %2 {
      %cst_9 = arith.constant 0.000000e+00 : f32
      %11 = vector.broadcast %cst_9 : f32 to vector<1x128xf32>
      %c0_10 = arith.constant 0 : index
      %c0_11 = arith.constant 0 : index
      %12 = vector.load %arg4[%c0_10, %c0_11] : memref<1x128xf32, #tpu.memory_space<vmem>>, vector<1x128xf32>
      tpu.vector_store %arg4[%c0_10, %c0_11], %11 {strides = array<i32>} : memref<1x128xf32, #tpu.memory_space<vmem>>, vector<1x128xf32>,
    } else {
    }
    %c0 = arith.constant 0 : index
    %c0_1 = arith.constant 0 : index
    %c0_2 = arith.constant 0 : index
    %3 = vector.load %arg3[%c0, %c0_1, %c0_2] : memref<1x64x128xf32, #tpu.memory_space<vmem>>, vector<1x64x128xf32>
    %c0_3 = arith.constant 0 : index
    %c0_4 = arith.constant 0 : index
    %4 = vector.load %arg4[%c0_3, %c0_4] : memref<1x128xf32, #tpu.memory_space<vmem>>, vector<1x128xf32>
    %cst = arith.constant dense<0.000000e+00> : vector<1x128xf32>
    %5 = vector.multi_reduction <add>, %3, %cst [1] : vector<1x64x128xf32> to vector<1x128xf32>
    %6 = arith.addf %4, %5 : vector<1x128xf32>
    %c0_5 = arith.constant 0 : index
    %c0_6 = arith.constant 0 : index
    %7 = vector.load %arg4[%c0_5, %c0_6] : memref<1x128xf32, #tpu.memory_space<vmem>>, vector<1x128xf32>
    tpu.vector_store %arg4[%c0_5, %c0_6], %6 {strides = array<i32>} : memref<1x128xf32, #tpu.memory_space<vmem>>, vector<1x128xf32>,
    %c0_i32_7 = arith.constant 0 : i32
    %8 = arith.cmpi eq, %arg2, %c0_i32_7 : i32
    %9 = arith.extui %8 : i1 to i32
    %c0_i32_8 = arith.constant 0 : i32
    %10 = arith.cmpi ne, %9, %c0_i32_8 : i32
    scf.if %10 {
      %c0_9 = arith.constant 0 : index
      %c0_10 = arith.constant 0 : index
      %11 = vector.load %arg4[%c0_9, %c0_10] : memref<1x128xf32, #tpu.memory_space<vmem>>, vector<1x128xf32>
      %cst_11 = arith.constant 1.562500e-02 : f32
      %12 = vector.broadcast %cst_11 : f32 to vector<1x128xf32>
      %13 = arith.mulf %11, %12 : vector<1x128xf32>
      %c0_12 = arith.constant 0 : index
      %c0_13 = arith.constant 0 : index
      %14 = vector.load %arg4[%c0_12, %c0_13] : memref<1x128xf32, #tpu.memory_space<vmem>>, vector<1x128xf32>
      tpu.vector_store %arg4[%c0_12, %c0_13], %13 {strides = array<i32>} : memref<1x128xf32, #tpu.memory_space<vmem>>, vector<1x128xf32>,
    } else {
    }
    return
  }
  func.func @transform_0(%arg0: i32, %arg1: i32, %arg2: i32) -> (i32, i32, i32) {
    %c0_i32 = arith.constant 0 : i32
    return %arg0, %arg2, %arg1 : i32, i32, i32
  }
  func.func @transform_1(%arg0: i32, %arg1: i32, %arg2: i32) -> (i32, i32) {
    %c0_i32 = arith.constant 0 : i32
    return %arg0, %arg1 : i32, i32
  }
}

</mosaic_0001>

<bundles_post_ra>
// kernel: tpu_custom_call.1
= control target key start
LH: loop header
LB: loop body
LE: loop exit
PB: predicated region body
PF: predicated region fallthrough
CT: control target
= control target key end

     0   :  { %6 = vsyncpa [#allocation3], 0  ;;  %s684_s0 = inlined_call_operand.hbm [shape: f32[1,64,256], index: 0, kind: input, shape index: {}]   ;;  %s685_s1 = inlined_call_operand.hbm [shape: f32[1,256], index: 1, kind: output, shape index: {}]  }
   0x1   :  { %8 = vsyncpa [#allocation3 + $0x1], 0 }
   0x2   :  { %9 = vsyncpa [#allocation4], 0 }
   0x3   :  { %11 = vsyncpa [#allocation4 + $0x1], 0  ;;  %s504_s6 = smov 0   ;;  %s506_s7 = smov 0  }
   0x4   :  { %s508_s8 = smov 0   ;;  %s510_s9 = smov 0  }
   0x5   :  { %s512_s10 = smov 0   ;;  %s514_s11 = smov 0  }
   0x6 LB: > { %s297_s12 = sadd.s32 4294967295, %s486_s11   ;;  %s298_s13 = sadd.s32 4294967294, %s486_s11   ;;  %s486_s11 = sphi %s514_s11, %s17_s11   ;;  %s482_s10 = sphi %s512_s10, %s699_s10   ;;  %s478_s9 = sphi %s510_s9, %s698_s9   ;;  %s474_s8 = sphi %s508_s8, %s697_s8   ;;  %s470_s7 = sphi %s506_s7, %s696_s7   ;;  %s466_s6 = sphi %s504_s6, %s695_s6  }
   0x7   : > { %s32_s14 = sadd.s32 1, %s482_s10  ;;  %s47_s15 = sadd.s32 1, %s474_s8 }
   0x8   : > { %p34_p0 = scmp.ge.s32.totalorder %s32_s14, 2  ;;  %p54_p1 = scmp.ne.s32.totalorder %s474_s8, %s470_s7 }
   0x9   : > { %p55_p2 = scmp.eq.s32.totalorder %s486_s11, 0  ;;  %p60_p3 = scmp.ne.s32.totalorder %s470_s7, %s466_s6 }
   0xa   : > { %s701_s14 = smov (%p34_p0, %s32_s14), 0  ;;  %p61_p5 = scmp.eq.s32.totalorder %s297_s12, 0 }
   0xb   : > { %p545_p4 = por %p55_p2, %p54_p1  ;;  %s43_s17 = ssub.s32 %s482_s10, %s701_s14 }
   0xc   : > { %p86_p6 = scmp.eq.s32.totalorder %s297_s12, 1  ;;  %p45_p7 = scmp.eq.s32.totalorder %s43_s17, 0 }
   0xd   : > { %p551_p8 = por %p61_p5, %p60_p3  ;;  %p92_p10 = scmp.eq.s32.totalorder %s298_s13, 1 }
   0xe   : > { %p555_p9 = por %p86_p6, %p54_p1  ;;  %p320_p13 = scmp.lt.s32.totalorder %s486_s11, 2 }
   0xf   : > { %s560_s20 = scalar_select %p45_p7, %s474_s8, %s47_s15  }
  0x10   : > { %s689_s19 = scalar_select %p555_p9, 1, 0 }
  0x11   : > { %p562_p11 = por %p92_p10, %p60_p3  ;;  %s112_s22 = sand.u32 1, %s474_s8  }
  0x12   : > { %s301_s23 = sshll.u32 %s112_s22, 6  ;;  %s302_s24 = sshll.u32 %s482_s10, 7 }
  0x13   : > { %s690_s21 = scalar_select %p562_p11, 1, 0 }
  0x14   : > { %s573_s27 = scalar_lea.hbm %s684_s0, %s302_s24  ;;  %s116_s28 = scalar_lea.vmem [#allocation2], %s301_s23 }
  0x15   : > { %s127_s29 = sshll.u32 %s116_s28, 4  ;;  %p579_p0 = pnand %p320_p13, %p545_p4  ;;  %s575_s29 = int_to_ptr.vmem [resolvable:$true] %s127_s29 }
  0x16   : > { %s583_s2 = scalar_lea.sflag [#allocation3], %s112_s22  ;;  %s374_s3 = scalar_lea.hbm %s573_s27, 1024 }
  0x17   : > { %p375_p1 = scmp.ne.s32.totalorder %s573_s27, %s374_s3  ;;  %p376_p2 = pneg %p579_p0 }
  0x18   : > { %s379_s12 = scalar_lea.hbm %s684_s0, 2048  ;;  %p380_p4 = scmp.lt.u32.totalorder %s573_s27, %s684_s0 }
  0x19   : > { %p377_p3 = pnand %p376_p2, %p375_p1  ;;  %p381_p6 = scmp.lt.u32.totalorder %s379_s12, %s374_s3 }
  0x1a   : > { %p383_p10 = scmp.lt.u32.totalorder %s374_s3, %s573_s27 }
  0x1b   : > { %p378_p5 = pneg %p377_p3  ;;  %p382_p7 = por %p381_p6, %p380_p4 }
  0x1d   : > { %p384_p13 = por %p383_p10, %p382_p7 }
  0x1f   : > { %p385_p12 = pnand %p384_p13, %p378_p5 }
  0x21   : > { %388 = shalt.err (!%p385_p12)
}
  0x22   : > { %s389_s16 = scalar_lea.vmem %s575_s29, 1024  ;;  %s488_s17 = smov [#allocation2]  }
  0x23   : > { %p390_p1 = scmp.ne.s32.totalorder %s575_s29, %s389_s16  ;;  %s394_s22 = sshll.u32 %s488_s17, 4  ;;  %s395_s22 = int_to_ptr.vmem [resolvable:$false] %s394_s22 }
  0x24   : > { %s396_s23 = scalar_lea.vmem %s395_s22, 2048  ;;  %p397_p9 = scmp.lt.s32.totalorder %s575_s29, %s395_s22 }
  0x25   : > { %p392_p3 = pnand %p390_p1, %p376_p2  ;;  %p398_p4 = scmp.lt.s32.totalorder %s396_s23, %s389_s16 }
  0x27   : > { %p393_p11 = pneg %p392_p3  ;;  %p399_p6 = por %p398_p4, %p397_p9 }
  0x29   : > { %p400_p7 = pnand %p399_p6, %p393_p11 }
  0x2b   : > { %403 = shalt.err (!%p400_p7)
}
  0x2c   : > { %s489_s24 = smov 256   ;;  %s490_s25 = smov 128  }
  0x2d   : > { %s491_s26 = smov 8   ;;  %p303_p12 = scmp.ge.s32.totalorder %s486_s11, 1 }
  0x2e   : > { %315 = dma.hbm_to_vmem [thread:$0]  (!%p579_p0), %s573_s27, 1024, %s575_s29, %s583_s2, %s489_s24, %s490_s25, %s491_s26  }
  0x2f   : > { %p135_p2 = scmp.lt.s32.totalorder %s486_s11, 3 }
  0x31   : > { %p136_p5 = pnand %p303_p12, %p135_p2 }
  0x32   : > { %s614_s28 = sand.u32 (!%p136_p5), 1, %s470_s7  }
  0x33   : > { %139 = sbr.rel (%p136_p5) target bundleno = 112 (0x70), region = 24  ;;  %s304_s3 = sshll.u32 (!%p136_p5), %s614_s28, 6 }
  0x34   : > { %s142_s4 = scalar_lea.sflag (!%p136_p5), [#allocation3], %s614_s28  ;;  %s145_s5 = scalar_lea.vmem (!%p136_p5), [#allocation2], %s304_s3 }
  0x3a   : > { %457 = dma.done.wait (%p551_p8), %s142_s4, 1024  }
  0x3b   : > { %459 = vsyncadd (%p551_p8), %s142_s4, 4294966272  ;;  %s623_s27 = scalar_lea.vmem [#allocation5], %s614_s28  ;;  %v492_v0 = vmov 0.0   ;;  %v169_v1 = vld [vmem:[%s145_s5] sm:$0xff]  ;;  %v170_v2 = vld [vmem:[%s145_s5 + $0x8] sm:$0xff]  ;;  %s305_s18 = sshll.u32 %s478_s9, 4 }
  0x3c   : > { %168 = vst [vmem:[%s623_s27] sm:$0x1] %v492_v0  ;;  %v171_v3 = vld [vmem:[%s145_s5 + $0x10] sm:$0xff]  ;;  %v178_v4 = vadd.f32 %v170_v2, %v169_v1  ;;  %v172_v5 = vld [vmem:[%s145_s5 + $0x18] sm:$0xff]  ;;  %v173_v7 = vld [vmem:[%s145_s5 + $0x20] sm:$0xff]  ;;  %s214_s29 = sshll.u32 %s623_s27, 4  ;;  %s634_s12 = scalar_lea.hbm %s685_s1, %s305_s18  ;;  %s636_s29 = int_to_ptr.vmem [resolvable:$true] %s214_s29 }
  0x3d   : > { %v174_v9 = vld [vmem:[%s145_s5 + $0x28] sm:$0xff]  ;;  %v175_v11 = vld [vmem:[%s145_s5 + $0x30] sm:$0xff]  ;;  %v176_v13 = vld [vmem:[%s145_s5 + $0x38] sm:$0xff]  ;;  %s200_s13 = scalar_lea.sflag [#allocation4], %s614_s28  ;;  %s404_s15 = scalar_lea.vmem %s636_s29, 16 }
  0x3e   : > { %v179_v6 = vadd.f32 %v178_v4, %v171_v3  ;;  %p405_p8 = scmp.ne.s32.totalorder %s636_s29, %s404_s15  ;;  %p692_p9 = scmp.ne.s32.totalorder %s689_s19, 0 }
  0x3f   : > { %s493_s9 = smov [#allocation5]  }
  0x40   : > { %v180_v8 = vadd.f32 %v179_v6, %v172_v5  ;;  %p406_p11 = pnand %p405_p8, %p692_p9  ;;  %s408_s16 = sshll.u32 %s493_s9, 4  ;;  %s409_s16 = int_to_ptr.vmem [resolvable:$false] %s408_s16 }
  0x41   : > { %s410_s17 = scalar_lea.vmem %s409_s16, 32  ;;  %p411_p10 = scmp.lt.s32.totalorder %s636_s29, %s409_s16 }
  0x42   : > { %v181_v10 = vadd.f32 %v180_v8, %v173_v7  ;;  %p407_p0 = pneg %p406_p11  ;;  %p412_p13 = scmp.lt.s32.totalorder %s410_s17, %s404_s15 }
  0x43   : > { %v177_v21 = vld [vmem:[%s623_s27] sm:$0x1] }
  0x44   : > { %v182_v12 = vadd.f32 %v181_v10, %v174_v9  ;;  %p413_p1 = por %p412_p13, %p411_p10 }
  0x46   : > { %v183_v14 = vadd.f32 %v182_v12, %v175_v11  ;;  %p414_p3 = pnand %p413_p1, %p407_p0 }
  0x48   : > { %v184_v15 = vadd.f32 %v183_v14, %v176_v13 }
  0x4a   : > { %v185_v16 = vrot.slane %v184_v15, 4 }
  0x4c   : > { %v186_v17 = vadd.f32 %v185_v16, %v184_v15 }
  0x4e   : > { %v187_v18 = vrot.slane %v186_v17, 2 }
  0x50   : > { %v188_v19 = vadd.f32 %v187_v18, %v186_v17 }
  0x52   : > { %v189_v20 = vrot.slane %v188_v19, 1 }
  0x54   : > { %v190_v22 = vadd.f32 %v189_v20, %v188_v19 }
  0x56   : > { %v191_v23 = vadd.f32 %v190_v22, %v177_v21 }
  0x58   : > { %192 = vst [vmem:[%s623_s27] sm:$0x1] %v191_v23 }
  0x5f   : > { %v196_v24 = vld [vmem:[%s623_s27] sm:$0x1] }
  0x60   : > { %v197_v25 = vmul.f32 0.015625, %v196_v24 }
  0x62   : > { %198 = vst [vmem:[%s623_s27] sm:$0x1] %v197_v25 }
  0x63   : > { %417 = shalt.err (!%p414_p3)
}
  0x64   : > { %s418_s22 = scalar_lea.hbm %s634_s12, 16  ;;  %s422_s25 = scalar_lea.hbm %s685_s1, 32 }
  0x65   : > { %p419_p4 = scmp.ne.s32.totalorder %s634_s12, %s418_s22  ;;  %p423_p12 = scmp.lt.u32.totalorder %s634_s12, %s685_s1 }
  0x66   : > { %p424_p2 = scmp.lt.u32.totalorder %s422_s25, %s418_s22  ;;  %p426_p8 = scmp.lt.u32.totalorder %s418_s22, %s634_s12 }
  0x67   : > { %p420_p6 = pnand %p419_p4, %p692_p9 }
  0x68   : > { %p425_p5 = por %p424_p2, %p423_p12 }
  0x69   : > { %p421_p7 = pneg %p420_p6 }
  0x6a   : > { %p427_p11 = por %p426_p8, %p425_p5 }
  0x6c   : > { %p428_p0 = pnand %p427_p11, %p421_p7 }
  0x6e   : > { %431 = shalt.err (!%p428_p0)
}
  0x6f   : > { %310 = dma.vmem_to_hbm [thread:$0]  (%p692_p9), %s636_s29, 16, %s634_s12, %s200_s13  }
  0x70 PF: > { %s226_s3 = sand.u32 1, %s466_s6   ;;  %p693_p10 = scmp.ne.s32.totalorder %s690_s21, 0 }
  0x71   : > { %p694_p13 = scmp.ge.s32.totalorder %s486_s11, 2  ;;  %s227_s4 = scalar_lea.sflag [#allocation4], %s226_s3 }
  0x73   : > { %p317_p1 = pnand %p694_p13, %p693_p10 }
  0x75   : > { %461 = dma.done.wait (!%p317_p1), %s227_s4, 16  }
  0x76   : > { %463 = vsyncadd (!%p317_p1), %s227_s4, 4294967280  ;;  %s17_s11 = sadd.s32 1, %s486_s11   ;;  %s695_s6 = smov %s470_s7 }
  0x77   : > { %p14_p3 = scmp.ge.s32.totalorder %s17_s11, 4   ;;  %s696_s7 = smov %s474_s8 }
  0x78   : > { %s697_s8 = smov %s560_s20  ;;  %s698_s9 = smov %s482_s10 }
  0x79   : > { %s699_s10 = smov %s701_s14  ;;  %16 = sbr.rel (!%p14_p3) target bundleno = 6 (0x6), region = 77 }
  0x80   :  { %231 = vsyncpa [#allocation3], 1 }
  0x81   :  { %233 = vsyncpa [#allocation3 + $0x1], 1 }
  0x82   :  { %234 = vsyncpa [#allocation4], 1 }
  0x83   :  { %236 = vsyncpa [#allocation4 + $0x1], 1 }

</bundles_post_ra>
